<compile_context>
chip_gen: v7x
topology: tpu7x:2x2x1
jax: 0.10.0
libtpu: 0.0.40
codegen_flags: <defaults>
</compile_context>

<pallas_src>
import functools
import math

import jax
import jax.numpy as jnp
from jax.experimental import pallas as pl
from jax.experimental.pallas import tpu as pltpu


def _round_up(x, m):
    return ((x + m - 1) // m) * m


def _pool_mean_kernel(x_ref, w_ref, o_ref, *, inv_k):
    """One node tile: mean over max_keep (VPU), then a single MXU matmul."""
    # x_ref block: (max_keep, TN, Dpad). Sum over k, scale by 1/max_keep.
    x_mean = jnp.sum(x_ref[...], axis=0) * inv_k            # (TN, Dpad) f32
    o_ref[...] = jnp.dot(
        x_mean, w_ref[...], preferred_element_type=jnp.float32
    ).astype(o_ref.dtype)


def fast_pool_aggregate(sampled_embeds, pool_matrix, *, tn=None):
    """sampled_embeds: [max_keep, N, D] f32; pool_matrix: [D, D] f32.

    Returns mean_k(sampled_embeds[k] @ pool_matrix) with shape [N, D],
    matching `embed_matrix.view(max_keep, N, D).mean(dim=0)` in the torch module.
    """
    max_keep, n_nodes, feat_dim = sampled_embeds.shape
    assert pool_matrix.shape == (feat_dim, feat_dim)

    d_pad = _round_up(feat_dim, 128)          # lane-dense feature axis

    # Choose node tile: big enough to pipeline well, small enough that
    # 2 x (max_keep, TN, Dpad) input buffers + output + W fit comfortably
    # under the 32 MiB default scoped VMEM limit (v7x-safe headroom).
    if tn is None:
        budget = 24 * 1024 * 1024
        bytes_per_row = (2 * max_keep + 2) * d_pad * 4
        tn = (budget - d_pad * d_pad * 4) // bytes_per_row
        tn = max(8, min(1024, (tn // 8) * 8))
    tn = min(tn, _round_up(n_nodes, 8))
    n_pad = _round_up(n_nodes, tn)

    x = sampled_embeds
    w = pool_matrix
    if n_pad != n_nodes or d_pad != feat_dim:
        x = jnp.pad(x, ((0, 0), (0, n_pad - n_nodes), (0, d_pad - feat_dim)))
    if d_pad != feat_dim:
        w = jnp.pad(w, ((0, d_pad - feat_dim), (0, d_pad - feat_dim)))

    out = pl.pallas_call(
        functools.partial(_pool_mean_kernel, inv_k=1.0 / max_keep),
        out_shape=jax.ShapeDtypeStruct((n_pad, d_pad), sampled_embeds.dtype),
        grid_spec=pltpu.PrefetchScalarGridSpec(
            num_scalar_prefetch=0,
            grid=(n_pad // tn,),
            in_specs=[
                pl.BlockSpec((max_keep, tn, d_pad), lambda i: (0, i, 0)),
                pl.BlockSpec((d_pad, d_pad), lambda i: (0, 0)),
            ],
            out_specs=pl.BlockSpec((tn, d_pad), lambda i: (i, 0)),
        ),
        compiler_params=pltpu.CompilerParams(
            dimension_semantics=("parallel",),
        ),
    )(x, w)

    return out[:n_nodes, :feat_dim]


if __name__ == "__main__":
    key = jax.random.PRNGKey(0)

    # Small synthetic graph / feature setup consistent with the module.
    num_entities = 20        # entities the `features` embedding covers
    n_nodes = 8              # len(to_neighs): batch of nodes to aggregate
    feat_dim = 32            # feature_dims[mode]
    max_keep = 10            # neighbors kept per node
    max_neighbors = 6        # synthetic adjacency width

    k_feat, k_pool, k_adj, k_samp = jax.random.split(key, 4)

    # `features` lookup table (plain-JAX glue, deterministic init).
    feature_table = jax.random.normal(k_feat, (num_entities, feat_dim), jnp.float32)

    # pool_matrix[mode]: xavier_uniform on a (feat_dim, feat_dim) parameter.
    bound = math.sqrt(6.0 / (feat_dim + feat_dim))
    pool_matrix = jax.random.uniform(
        k_pool, (feat_dim, feat_dim), jnp.float32, minval=-bound, maxval=bound
    )

    # Synthetic to_neighs: each node has `max_neighbors` neighbor entity ids.
    to_neighs = jax.random.randint(
        k_adj, (n_nodes, max_neighbors), 0, num_entities, jnp.int32
    )

    # Random neighbor sampling, `max_keep` draws per node (deterministic PRNG
    # stands in for python `random.random()` in the original forward).
    # TODO(synk): python-side random.random() dropout sampling is host-side glue,
    # reproduced here deterministically with jax.random.
    samp_cols = jax.random.randint(
        k_samp, (max_keep, n_nodes), 0, max_neighbors, jnp.int32
    )
    samp_neighs = to_neighs[jnp.arange(n_nodes)[None, :], samp_cols]  # [max_keep, n_nodes]

    # features(samp_neighs) -> [max_keep, n_nodes, feat_dim]
    sampled_embeds = feature_table[samp_neighs]

    out = fast_pool_aggregate(sampled_embeds, pool_matrix)
    out = jax.block_until_ready(out)

    # Reference check in plain JAX (embed @ W, then mean over max_keep).
    ref = jnp.mean(
        jnp.einsum("knd,de->kne", sampled_embeds, pool_matrix), axis=0
    )
    assert out.shape == (n_nodes, feat_dim)
    assert jnp.allclose(out, ref, atol=1e-5, rtol=1e-5)

    print("KERNEL_OK")
</pallas_src>

<mosaic_0001>
module attributes {stable_mosaic.version = 11 : i64} {
  func.func @_pool_mean_kernel(%arg0: i32, %arg1: memref<10x8x128xf32, #tpu.memory_space<vmem>>, %arg2: memref<128x128xf32, #tpu.memory_space<vmem>>, %arg3: memref<8x128xf32, #tpu.memory_space<vmem>>) attributes {dimension_semantics = [#tpu.dimension_semantics<parallel>], iteration_bounds = array<i64: 1>, scalar_prefetch = 0 : i64, scratch_operands = 0 : i64, tpu.core_type = #tpu.core_type<tc>, window_params = [{transform_indices = @transform_0, window_bounds = array<i64: 10, 8, 128>}, {pipeline_mode = #tpu.pipeline_mode<synchronous>, transform_indices = @transform_1, window_bounds = array<i64: 128, 128>}, {transform_indices = @transform_2, window_bounds = array<i64: 8, 128>}]} {
    %c0 = arith.constant 0 : index
    %c0_0 = arith.constant 0 : index
    %c0_1 = arith.constant 0 : index
    %0 = vector.load %arg1[%c0, %c0_0, %c0_1] : memref<10x8x128xf32, #tpu.memory_space<vmem>>, vector<10x8x128xf32>
    %cst = arith.constant dense<0.000000e+00> : vector<8x128xf32>
    %1 = vector.multi_reduction <add>, %0, %cst [0] : vector<10x8x128xf32> to vector<8x128xf32>
    %cst_2 = arith.constant 1.000000e-01 : f32
    %2 = vector.broadcast %cst_2 : f32 to vector<8x128xf32>
    %3 = arith.mulf %1, %2 : vector<8x128xf32>
    %c0_3 = arith.constant 0 : index
    %c0_4 = arith.constant 0 : index
    %4 = vector.load %arg2[%c0_3, %c0_4] : memref<128x128xf32, #tpu.memory_space<vmem>>, vector<128x128xf32>
    %cst_5 = arith.constant dense<0.000000e+00> : vector<8x128xf32>
    %5 = tpu.matmul %3, %4, %cst_5 {dimension_numbers = #tpu.dot_dimension_numbers<[1], [0], [0], [1], [0, 0, 1, 1], [], []>} : vector<8x128xf32>, vector<128x128xf32>, vector<8x128xf32> -> vector<8x128xf32>
    %c0_6 = arith.constant 0 : index
    %c0_7 = arith.constant 0 : index
    %6 = vector.load %arg3[%c0_6, %c0_7] : memref<8x128xf32, #tpu.memory_space<vmem>>, vector<8x128xf32>
    tpu.vector_store %arg3[%c0_6, %c0_7], %5 {strides = array<i32>} : memref<8x128xf32, #tpu.memory_space<vmem>>, vector<8x128xf32>,
    return
  }
  func.func @transform_0(%arg0: i32) -> (i32, i32, i32) {
    %c0_i32 = arith.constant 0 : i32
    %c0_i32_0 = arith.constant 0 : i32
    %c0_i32_1 = arith.constant 0 : i32
    return %c0_i32, %arg0, %c0_i32_0 : i32, i32, i32
  }
  func.func @transform_1(%arg0: i32) -> (i32, i32) {
    %c0_i32 = arith.constant 0 : i32
    %c0_i32_0 = arith.constant 0 : i32
    %c0_i32_1 = arith.constant 0 : i32
    return %c0_i32, %c0_i32_0 : i32, i32
  }
  func.func @transform_2(%arg0: i32) -> (i32, i32) {
    %c0_i32 = arith.constant 0 : i32
    %c0_i32_0 = arith.constant 0 : i32
    return %arg0, %c0_i32 : i32, i32
  }
}

</mosaic_0001>

<bundles_post_ra>
// kernel: tpu_custom_call.1
= control target key start
LH: loop header
LB: loop body
LE: loop exit
PB: predicated region body
PF: predicated region fallthrough
CT: control target
= control target key end

     0   :  { %7 = vsyncpa [#allocation3], 0  ;;  %s378_s0 = inlined_call_operand.hbm [shape: f32[10,8,128], index: 0, kind: input, shape index: {}]   ;;  %s379_s1 = inlined_call_operand.hbm [shape: f32[128,128], index: 1, kind: input, shape index: {}]   ;;  %s380_s2 = inlined_call_operand.hbm [shape: f32[8,128], index: 2, kind: output, shape index: {}]  }
   0x1   :  { %8 = vsyncpa [#allocation6], 0 }
   0x2   :  { %9 = vsyncpa [#allocation4], 0  ;;  %s319_s9 = smov [#allocation2]   ;;  %s247_s13 = scalar_lea.hbm %s378_s0, 1280 }
   0x3   :  { %s15_s10 = sshll.u32 %s319_s9, 4  ;;  %p248_p0 = scmp.ne.s32.totalorder %s378_s0, %s247_s13  ;;  %s16_s10 = int_to_ptr.vmem [resolvable:$true] %s15_s10 }
   0x4   :  { %p251_p1 = scmp.lt.u32.totalorder %s247_s13, %s378_s0 }
   0x6   :  { %p253_p2 = pnand %p251_p1, %p248_p0 }
   0x8   :  { %256 = shalt.err (!%p253_p2)
}
   0x9   :  { %s257_s18 = scalar_lea.vmem %s16_s10, 1280  ;;  %p262_p4 = scmp.lt.s32.totalorder %s16_s10, %s16_s10 }
   0xa   :  { %p258_p3 = scmp.ne.s32.totalorder %s16_s10, %s257_s18  ;;  %p263_p5 = scmp.lt.s32.totalorder %s257_s18, %s257_s18 }
   0xc   :  { %p264_p6 = por %p263_p5, %p262_p4 }
   0xe   :  { %p265_p7 = pnand %p264_p6, %p258_p3 }
  0x10   :  { %268 = shalt.err (!%p265_p7)
}
  0x11   :  { %s320_s19 = smov 128   ;;  %s321_s20 = smov 8  }
  0x12   :  { %21 = dma.hbm_to_vmem [thread:$0]  %s378_s0, 1280, %s16_s10, [#allocation3], %s320_s19, %s320_s19, %s321_s20  }
  0x13   :  { %s322_s23 = smov [#allocation5]   ;;  %s269_s27 = scalar_lea.hbm %s379_s1, 2048 }
  0x14   :  { %s27_s24 = sshll.u32 %s322_s23, 4  ;;  %p270_p8 = scmp.ne.s32.totalorder %s379_s1, %s269_s27  ;;  %s28_s24 = int_to_ptr.vmem [resolvable:$true] %s27_s24 }
  0x15   :  { %p273_p9 = scmp.lt.u32.totalorder %s269_s27, %s379_s1 }
  0x17   :  { %p275_p10 = pnand %p273_p9, %p270_p8 }
  0x19   :  { %278 = shalt.err (!%p275_p10)
}
  0x1a   :  { %s279_s4 = scalar_lea.vmem %s28_s24, 2048  ;;  %p284_p12 = scmp.lt.s32.totalorder %s28_s24, %s28_s24 }
  0x1b   :  { %p280_p11 = scmp.ne.s32.totalorder %s28_s24, %s279_s4  ;;  %p285_p13 = scmp.lt.s32.totalorder %s279_s4, %s279_s4 }
  0x1d   :  { %p286_p0 = por %p285_p13, %p284_p12 }
  0x1f   :  { %p287_p1 = pnand %p286_p0, %p280_p11 }
  0x21   :  { %290 = shalt.err (!%p287_p1)
}
  0x22   :  { %33 = dma.hbm_to_vmem [thread:$0]  %s379_s1, 2048, %s28_s24, [#allocation6], %s320_s19, %s320_s19, %s321_s20  }
  0x23   :  { %313 = dma.done.wait [#allocation3], 1280  }
  0x24   :  { %314 = vsyncadd [#allocation3], 4294966016 }
  0x25   :  { %315 = dma.done.wait [#allocation6], 2048  }
  0x26   :  { %316 = vsyncadd [#allocation6], 4294965248  ;;  %v323_v0 = vmov 0.0|0.0   ;;  %vm324_vm0 = vmmov 0   ;;  %v325_v1 = vmov 0.0   ;;  %v60_v2 = vld [vmem:[#allocation5] sm:$0xff] }
  0x27   :  { %215 = vmatprep.subr.bf16.mxu0 %v323_v0  ;;  %212 = vmatprep.mubr.msk.f32.mxu0 %vm324_vm0, %v325_v1  ;;  %v61_v3 = vld [vmem:[#allocation5 + $0x8] sm:$0xff]  ;;  %v62_v4 = vld [vmem:[#allocation5 + $0x10] sm:$0xff]  ;;  %v63_v6 = vld [vmem:[#allocation5 + $0x18] sm:$0xff]  ;;  %s326_s1 = smov [#allocation7]  }
  0x28   :  { %v216_v5 = vpack.c.bf16 %v61_v3, %v60_v2  ;;  %v219_v7 = vpack.c.bf16 %v63_v6, %v62_v4  ;;  %v64_v8 = vld [vmem:[#allocation5 + $0x20] sm:$0xff]  ;;  %v65_v9 = vld [vmem:[#allocation5 + $0x28] sm:$0xff]  ;;  %v40_v10 = vld [vmem:[#allocation2] sm:$0xff]  ;;  %s153_s6 = sshll.u32 %s326_s1, 4  ;;  %s154_s6 = int_to_ptr.vmem [resolvable:$true] %s153_s6 }
  0x29   :  { %v41_v11 = vld [vmem:[#allocation2 + $0x8] sm:$0xff]  ;;  %v42_v12 = vld [vmem:[#allocation2 + $0x10] sm:$0xff]  ;;  %v222_v14 = vpack.c.bf16 %v65_v9, %v64_v8  ;;  %v43_v15 = vld [vmem:[#allocation2 + $0x18] sm:$0xff]  ;;  %s291_s7 = scalar_lea.vmem %s154_s6, 128  ;;  %p296_p3 = scmp.lt.s32.totalorder %s154_s6, %s154_s6 }
  0x2a   :  { %217 = vmatpush3.bf16.msra.mxu0 %v216_v5  ;;  %v50_v13 = vadd.f32 %v41_v11, %v40_v10  ;;  %v66_v16 = vld [vmem:[#allocation5 + $0x30] sm:$0xff]  ;;  %v67_v17 = vld [vmem:[#allocation5 + $0x38] sm:$0xff]  ;;  %v68_v23 = vld [vmem:[#allocation5 + $0x40] sm:$0xff]  ;;  %p292_p2 = scmp.ne.s32.totalorder %s154_s6, %s291_s7  ;;  %p297_p4 = scmp.lt.s32.totalorder %s291_s7, %s291_s7 }
  0x2b   :  { %218 = vmatprep.subr.bf16.mxu0 %v323_v0  ;;  %v44_v19 = vld [vmem:[#allocation2 + $0x20] sm:$0xff]  ;;  %v225_v21 = vpack.c.bf16 %v67_v17, %v66_v16  ;;  %v45_v22 = vld [vmem:[#allocation2 + $0x28] sm:$0xff]  ;;  %v69_v24 = vld [vmem:[#allocation5 + $0x48] sm:$0xff] }
  0x2c   :  { %v51_v18 = vadd.f32 %v50_v13, %v42_v12  ;;  %v46_v26 = vld [vmem:[#allocation2 + $0x30] sm:$0xff]  ;;  %v228_v28 = vpack.c.bf16 %v69_v24, %v68_v23  ;;  %v47_v29 = vld [vmem:[#allocation2 + $0x38] sm:$0xff]  ;;  %v70_v30 = vld [vmem:[#allocation5 + $0x50] sm:$0xff]  ;;  %p298_p5 = por %p297_p4, %p296_p3 }
  0x2d   :  { %v71_v31 = vld [vmem:[#allocation5 + $0x58] sm:$0xff]  ;;  %v48_v35 = vld [vmem:[#allocation2 + $0x40] sm:$0xff]  ;;  %v72_v36 = vld [vmem:[#allocation5 + $0x60] sm:$0xff] }
  0x2e   :  { %220 = vmatpush3.bf16.msra.mxu0 %v219_v7  ;;  %v52_v20 = vadd.f32 %v51_v18, %v43_v15  ;;  %v231_v34 = vpack.c.bf16 %v71_v31, %v70_v30  ;;  %v73_v37 = vld [vmem:[#allocation5 + $0x68] sm:$0xff]  ;;  %v49_v40 = vld [vmem:[#allocation2 + $0x48] sm:$0xff]  ;;  %v74_v41 = vld [vmem:[#allocation5 + $0x70] sm:$0xff]  ;;  %p299_p6 = pnand %p298_p5, %p292_p2 }
  0x2f   :  { %221 = vmatprep.subr.bf16.mxu0 %v323_v0  ;;  %v234_v39 = vpack.c.bf16 %v73_v37, %v72_v36  ;;  %v75_v42 = vld [vmem:[#allocation5 + $0x78] sm:$0xff] }
  0x30   :  { %v53_v25 = vadd.f32 %v52_v20, %v44_v19  ;;  %v237_v44 = vpack.c.bf16 %v75_v42, %v74_v41 }
  0x32   :  { %223 = vmatpush3.bf16.msra.mxu0 %v222_v14  ;;  %v54_v27 = vadd.f32 %v53_v25, %v45_v22 }
  0x33   :  { %224 = vmatprep.subr.bf16.mxu0 %v323_v0 }
  0x34   :  { %v55_v32 = vadd.f32 %v54_v27, %v46_v26 }
  0x36   :  { %226 = vmatpush3.bf16.msra.mxu0 %v225_v21  ;;  %v56_v33 = vadd.f32 %v55_v32, %v47_v29 }
  0x37   :  { %227 = vmatprep.subr.bf16.mxu0 %v323_v0 }
  0x38   :  { %v57_v38 = vadd.f32 %v56_v33, %v48_v35 }
  0x3a   :  { %229 = vmatpush3.bf16.msra.mxu0 %v228_v28  ;;  %v58_v43 = vadd.f32 %v57_v38, %v49_v40 }
  0x3b   :  { %230 = vmatprep.subr.bf16.mxu0 %v323_v0 }
  0x3c   :  { %v59_v45 = vmul.f32 0.1, %v58_v43 }
  0x3e   :  { %232 = vmatpush3.bf16.msra.mxu0 %v231_v34 }
  0x3f   :  { %233 = vmatprep.subr.bf16.mxu0 %v323_v0 }
  0x42   :  { %235 = vmatpush3.bf16.msra.mxu0 %v234_v39 }
  0x43   :  { %236 = vmatprep.subr.bf16.mxu0 %v323_v0 }
  0x46   :  { %238 = vmatpush3.bf16.msra.mxu0 %v237_v44 }
  0x49   :  { %213 = vmatmul.mubr.f32.vlgmr.msra.gmra.mrb[0].mxu0 %v59_v45 }
 0x11c   :  { %v142_v46 = vpop.f32.mrb[0].mxu0 }
 0x11d   :  { %146 = vst [vmem:[#allocation7] sm:$0xff] %v142_v46  ;;  %v214_v47 = vpop.f32.mrb[1].mxu0 }
 0x11e   :  { %302 = shalt.err (!%p299_p6)
}
 0x11f   :  { %s303_s10 = scalar_lea.hbm %s380_s2, 128 }
 0x120   :  { %p304_p7 = scmp.ne.s32.totalorder %s380_s2, %s303_s10  ;;  %p307_p8 = scmp.lt.u32.totalorder %s303_s10, %s380_s2 }
 0x122   :  { %p309_p9 = pnand %p307_p8, %p304_p7 }
 0x124   :  { %312 = shalt.err (!%p309_p9)
}
 0x125   :  { %156 = dma.vmem_to_hbm [thread:$0]  %s154_s6, 128, %s380_s2, [#allocation4]  }
 0x126   :  { %317 = dma.done.wait [#allocation4], 128  }
 0x127   :  { %318 = vsyncadd [#allocation4], 4294967168 }
 0x128   :  { %160 = vsyncpa [#allocation3], 1 }
 0x129   :  { %161 = vsyncpa [#allocation6], 1 }
 0x12a   :  { %162 = vsyncpa [#allocation4], 1 }

</bundles_post_ra>
